<compile_context>
chip_gen: v5e
topology: v5e:2x2
jax: 0.10.0
libtpu: 0.0.40
codegen_flags: <defaults>
</compile_context>

<pallas_src>
import jax
import jax.numpy as jnp
from jax.experimental import pallas as pl
from jax.experimental.pallas import tpu as pltpu


def mlp_kernel(x_ref, w1_ref, b1_ref, w2_ref, b2_ref, w3_ref, b3_ref, out_ref):
    # Cast the x tile to bf16 in VMEM (VPU, free vs. the HBM stream); MXU accumulates f32.
    x = x_ref[...].astype(jnp.bfloat16)

    # fc1 + relu
    h1 = jnp.dot(x, w1_ref[...], preferred_element_type=jnp.float32) + b1_ref[...]
    h1 = jnp.maximum(h1, 0.0)

    # fc2 + relu (bf16 operands, f32 accumulation)
    h2 = jnp.dot(h1.astype(jnp.bfloat16), w2_ref[...],
                 preferred_element_type=jnp.float32) + b2_ref[...]
    h2 = jnp.maximum(h2, 0.0)

    # fc3
    logits = jnp.dot(h2.astype(jnp.bfloat16), w3_ref[...],
                     preferred_element_type=jnp.float32) + b3_ref[...]

    # log_softmax over the last dim (dim=1 in torch), max-shifted for stability
    m = jnp.max(logits, axis=-1, keepdims=True)
    shifted = logits - m
    lse = jnp.log(jnp.sum(jnp.exp(shifted), axis=-1, keepdims=True))
    out_ref[...] = (shifted - lse).astype(out_ref.dtype)


def _select_tile_and_vmem(batch, x_itemsize):
    """Pick (block_b, vmem_limit_bytes) from the chip generation and x dtype."""
    try:
        vmem_cap = int(pltpu.get_tpu_info().vmem_capacity_bytes)
    except Exception:
        vmem_cap = 64 * 1024 * 1024  # conservative: v7x per-TC VMEM

    if vmem_cap >= 100 * 1024 * 1024:
        # v5e / v6e: 128 MiB physical VMEM, single TensorCore.
        vmem_limit = 96 * 1024 * 1024
        hard_cap = 8192
        min_grid = 1
    else:
        # v7x: 64 MiB per TensorCore, 2 TensorCores sharded via "parallel".
        vmem_limit = 48 * 1024 * 1024
        hard_cap = 4096
        min_grid = 2

    # Steady-state VMEM bytes per batch row:
    #   2 double-buffered x-tile buffers + in-kernel bf16 copy of x
    #   + f32/bf16 h1/h2/logits temporaries + double-buffered output tile.
    bytes_per_row = 2 * 784 * x_itemsize + 784 * 2 + 2 * (64 + 32 + 10) * 4 + 2 * 10 * 4
    budget = int(vmem_limit * 0.85)

    block_b = budget // bytes_per_row
    block_b = max(8, min(block_b, hard_cap))
    block_b = (block_b // 8) * 8
    # Never tile bigger than the (rounded-up) batch.
    block_b = min(block_b, pl.cdiv(batch, 8) * 8)
    # On v7x keep grid_b >= 2 so both TensorCores get work (when the batch allows it).
    if min_grid > 1 and batch > min_grid * 8:
        block_b = min(block_b, pl.cdiv(batch, min_grid * 8) * 8)
    return block_b, vmem_limit


def net_forward(x, params):
    """x: (B, 1, 28, 28) or (B, 784). Returns (B, 10) float32 log-probabilities."""
    w1, b1, w2, b2, w3, b3 = params

    x = x.reshape(-1, 28 * 28)              # no dtype cast, no padding: one HBM pass
    B = x.shape[0]
    x_itemsize = jnp.dtype(x.dtype).itemsize

    block_b, vmem_limit = _select_tile_and_vmem(B, x_itemsize)
    grid_b = pl.cdiv(B, block_b)            # ragged batch -> masked edge block

    # Weights in bf16 (tiny, one-time traffic); biases stay f32.
    w1 = w1.astype(jnp.bfloat16)
    w2 = w2.astype(jnp.bfloat16)
    w3 = w3.astype(jnp.bfloat16)
    b1 = b1.reshape(1, -1).astype(jnp.float32)
    b2 = b2.reshape(1, -1).astype(jnp.float32)
    b3 = b3.reshape(1, -1).astype(jnp.float32)

    batch_map = lambda i: (i, 0)
    full_map = lambda i: (0, 0)

    flops = 2 * B * (784 * 64 + 64 * 32 + 32 * 10)
    bytes_accessed = (
        B * 784 * x_itemsize               # x stream (read once, in its native dtype)
        + B * 10 * 4                       # output (f32)
        + (784 * 64 + 64 * 32 + 32 * 10) * 2   # bf16 weights
        + (64 + 32 + 10) * 4               # f32 biases
    )
    cost = pl.CostEstimate(
        flops=flops,
        transcendentals=B * 11,            # 10x exp + 1x log per row
        bytes_accessed=bytes_accessed,
    )

    out = pl.pallas_call(
        mlp_kernel,
        out_shape=jax.ShapeDtypeStruct((B, 10), jnp.float32),
        grid_spec=pltpu.PrefetchScalarGridSpec(
            num_scalar_prefetch=0,
            grid=(grid_b,),
            in_specs=[
                pl.BlockSpec((block_b, 784), batch_map),   # x tile (caller dtype)
                pl.BlockSpec((784, 64), full_map),         # W1 (bf16)
                pl.BlockSpec((1, 64), full_map),           # b1 (f32)
                pl.BlockSpec((64, 32), full_map),          # W2 (bf16)
                pl.BlockSpec((1, 32), full_map),           # b2 (f32)
                pl.BlockSpec((32, 10), full_map),          # W3 (bf16)
                pl.BlockSpec((1, 10), full_map),           # b3 (f32)
            ],
            out_specs=pl.BlockSpec((block_b, 10), batch_map),
        ),
        compiler_params=pltpu.CompilerParams(
            dimension_semantics=("parallel",),   # megacore-shardable on v7x
            vmem_limit_bytes=vmem_limit,
        ),
        cost_estimate=cost,
    )(x, w1, b1, w2, b2, w3, b3)

    return out


def init_params(key):
    """Deterministic init matching nn.Linear shapes (uniform +/- 1/sqrt(fan_in))."""
    def linear(k, fan_in, fan_out):
        kw, kb = jax.random.split(k)
        bound = 1.0 / jnp.sqrt(fan_in)
        w = jax.random.uniform(kw, (fan_in, fan_out), jnp.float32, -bound, bound)
        b = jax.random.uniform(kb, (fan_out,), jnp.float32, -bound, bound)
        return w, b

    k1, k2, k3 = jax.random.split(key, 3)
    w1, b1 = linear(k1, 784, 64)
    w2, b2 = linear(k2, 64, 32)
    w3, b3 = linear(k3, 32, 10)
    return (w1, b1, w2, b2, w3, b3)


def reference_forward_f32(x, params):
    w1, b1, w2, b2, w3, b3 = params
    x = x.reshape(-1, 784).astype(jnp.float32)
    h1 = jax.nn.relu(x @ w1 + b1)
    h2 = jax.nn.relu(h1 @ w2 + b2)
    logits = h2 @ w3 + b3
    return jax.nn.log_softmax(logits, axis=1)


if __name__ == "__main__":
    key = jax.random.PRNGKey(0)
    kp, kx = jax.random.split(key)

    params = init_params(kp)

    # small MNIST-like batch
    x = jax.random.normal(kx, (8, 1, 28, 28), jnp.float32)
    out = jax.block_until_ready(net_forward(x, params))
    ref = reference_forward_f32(x, params)
    assert out.shape == (8, 10)
    # bf16 matmul operands -> looser tolerance than an f32-only check
    assert jnp.allclose(out, ref, atol=3e-2, rtol=3e-2), "mismatch vs JAX reference (B=8)"

    # ragged batch: exercises the masked edge-block path (no wrapper-side padding)
    x2 = jax.random.normal(jax.random.PRNGKey(1), (6, 1, 28, 28), jnp.float32)
    out2 = jax.block_until_ready(net_forward(x2, params))
    ref2 = reference_forward_f32(x2, params)
    assert out2.shape == (6, 10)
    assert jnp.allclose(out2, ref2, atol=3e-2, rtol=3e-2), "mismatch vs JAX reference (B=6)"

    print("KERNEL_OK")
</pallas_src>

<mosaic_0001>
module attributes {stable_mosaic.version = 11 : i64} {
  func.func @mlp_kernel(%arg0: i32, %arg1: memref<8x784xf32, #tpu.memory_space<vmem>>, %arg2: memref<784x64xbf16, #tpu.memory_space<vmem>>, %arg3: memref<1x64xf32, #tpu.memory_space<vmem>>, %arg4: memref<64x32xbf16, #tpu.memory_space<vmem>>, %arg5: memref<1x32xf32, #tpu.memory_space<vmem>>, %arg6: memref<32x10xbf16, #tpu.memory_space<vmem>>, %arg7: memref<1x10xf32, #tpu.memory_space<vmem>>, %arg8: memref<8x10xf32, #tpu.memory_space<vmem>>) attributes {dimension_semantics = [#tpu.dimension_semantics<parallel>], iteration_bounds = array<i64: 1>, scalar_prefetch = 0 : i64, scratch_operands = 0 : i64, tpu.core_type = #tpu.core_type<tc>, window_params = [{transform_indices = @transform_0, window_bounds = array<i64: 8, 784>}, {pipeline_mode = #tpu.pipeline_mode<synchronous>, transform_indices = @transform_1, window_bounds = array<i64: 784, 64>}, {pipeline_mode = #tpu.pipeline_mode<synchronous>, transform_indices = @transform_2, window_bounds = array<i64: 1, 64>}, {pipeline_mode = #tpu.pipeline_mode<synchronous>, transform_indices = @transform_3, window_bounds = array<i64: 64, 32>}, {pipeline_mode = #tpu.pipeline_mode<synchronous>, transform_indices = @transform_4, window_bounds = array<i64: 1, 32>}, {pipeline_mode = #tpu.pipeline_mode<synchronous>, transform_indices = @transform_5, window_bounds = array<i64: 32, 10>}, {pipeline_mode = #tpu.pipeline_mode<synchronous>, transform_indices = @transform_6, window_bounds = array<i64: 1, 10>}, {transform_indices = @transform_7, window_bounds = array<i64: 8, 10>}]} {
    %c0 = arith.constant 0 : index
    %c0_0 = arith.constant 0 : index
    %0 = vector.load %arg1[%c0, %c0_0] : memref<8x784xf32, #tpu.memory_space<vmem>>, vector<8x784xf32>
    %1 = arith.truncf %0 : vector<8x784xf32> to vector<8x784xbf16>
    %c0_1 = arith.constant 0 : index
    %c0_2 = arith.constant 0 : index
    %2 = vector.load %arg2[%c0_1, %c0_2] : memref<784x64xbf16, #tpu.memory_space<vmem>>, vector<784x64xbf16>
    %cst = arith.constant dense<0.000000e+00> : vector<8x64xf32>
    %3 = tpu.matmul %1, %2, %cst {dimension_numbers = #tpu.dot_dimension_numbers<[1], [0], [0], [1], [0, 0, 1, 1], [], []>} : vector<8x784xbf16>, vector<784x64xbf16>, vector<8x64xf32> -> vector<8x64xf32>
    %c0_3 = arith.constant 0 : index
    %c0_4 = arith.constant 0 : index
    %4 = vector.load %arg3[%c0_3, %c0_4] : memref<1x64xf32, #tpu.memory_space<vmem>>, vector<1x64xf32>
    %5 = vector.broadcast %4 : vector<1x64xf32> to vector<8x64xf32>
    %6 = arith.addf %3, %5 : vector<8x64xf32>
    %cst_5 = arith.constant 0.000000e+00 : f32
    %7 = vector.broadcast %cst_5 : f32 to vector<8x64xf32>
    %8 = arith.maximumf %6, %7 : vector<8x64xf32>
    %9 = arith.truncf %8 : vector<8x64xf32> to vector<8x64xbf16>
    %c0_6 = arith.constant 0 : index
    %c0_7 = arith.constant 0 : index
    %10 = vector.load %arg4[%c0_6, %c0_7] : memref<64x32xbf16, #tpu.memory_space<vmem>>, vector<64x32xbf16>
    %cst_8 = arith.constant dense<0.000000e+00> : vector<8x32xf32>
    %11 = tpu.matmul %9, %10, %cst_8 {dimension_numbers = #tpu.dot_dimension_numbers<[1], [0], [0], [1], [0, 0, 1, 1], [], []>} : vector<8x64xbf16>, vector<64x32xbf16>, vector<8x32xf32> -> vector<8x32xf32>
    %c0_9 = arith.constant 0 : index
    %c0_10 = arith.constant 0 : index
    %12 = vector.load %arg5[%c0_9, %c0_10] : memref<1x32xf32, #tpu.memory_space<vmem>>, vector<1x32xf32>
    %13 = vector.broadcast %12 : vector<1x32xf32> to vector<8x32xf32>
    %14 = arith.addf %11, %13 : vector<8x32xf32>
    %cst_11 = arith.constant 0.000000e+00 : f32
    %15 = vector.broadcast %cst_11 : f32 to vector<8x32xf32>
    %16 = arith.maximumf %14, %15 : vector<8x32xf32>
    %17 = arith.truncf %16 : vector<8x32xf32> to vector<8x32xbf16>
    %c0_12 = arith.constant 0 : index
    %c0_13 = arith.constant 0 : index
    %18 = vector.load %arg6[%c0_12, %c0_13] : memref<32x10xbf16, #tpu.memory_space<vmem>>, vector<32x10xbf16>
    %cst_14 = arith.constant dense<0.000000e+00> : vector<8x10xf32>
    %19 = tpu.matmul %17, %18, %cst_14 {dimension_numbers = #tpu.dot_dimension_numbers<[1], [0], [0], [1], [0, 0, 1, 1], [], []>} : vector<8x32xbf16>, vector<32x10xbf16>, vector<8x10xf32> -> vector<8x10xf32>
    %c0_15 = arith.constant 0 : index
    %c0_16 = arith.constant 0 : index
    %20 = vector.load %arg7[%c0_15, %c0_16] : memref<1x10xf32, #tpu.memory_space<vmem>>, vector<1x10xf32>
    %21 = vector.broadcast %20 : vector<1x10xf32> to vector<8x10xf32>
    %22 = arith.addf %19, %21 : vector<8x10xf32>
    %cst_17 = arith.constant dense<0xFF800000> : vector<8xf32>
    %23 = vector.multi_reduction <maximumf>, %22, %cst_17 [1] : vector<8x10xf32> to vector<8xf32>
    %24 = vector.shape_cast %23 : vector<8xf32> to vector<8x1xf32>
    %25 = vector.broadcast %24 : vector<8x1xf32> to vector<8x10xf32>
    %26 = arith.subf %22, %25 : vector<8x10xf32>
    %27 = math.exp %26 : vector<8x10xf32>
    %cst_18 = arith.constant dense<0.000000e+00> : vector<8xf32>
    %28 = vector.multi_reduction <add>, %27, %cst_18 [1] : vector<8x10xf32> to vector<8xf32>
    %29 = vector.shape_cast %28 : vector<8xf32> to vector<8x1xf32>
    %30 = math.log %29 : vector<8x1xf32>
    %31 = vector.broadcast %30 : vector<8x1xf32> to vector<8x10xf32>
    %32 = arith.subf %26, %31 : vector<8x10xf32>
    %c0_19 = arith.constant 0 : index
    %c0_20 = arith.constant 0 : index
    %33 = vector.load %arg8[%c0_19, %c0_20] : memref<8x10xf32, #tpu.memory_space<vmem>>, vector<8x10xf32>
    tpu.vector_store %arg8[%c0_19, %c0_20], %32 {strides = array<i32>} : memref<8x10xf32, #tpu.memory_space<vmem>>, vector<8x10xf32>,
    return
  }
  func.func @transform_0(%arg0: i32) -> (i32, i32) {
    %c0_i32 = arith.constant 0 : i32
    %c0_i32_0 = arith.constant 0 : i32
    return %arg0, %c0_i32 : i32, i32
  }
  func.func @transform_1(%arg0: i32) -> (i32, i32) {
    %c0_i32 = arith.constant 0 : i32
    %c0_i32_0 = arith.constant 0 : i32
    %c0_i32_1 = arith.constant 0 : i32
    return %c0_i32, %c0_i32_0 : i32, i32
  }
  func.func @transform_2(%arg0: i32) -> (i32, i32) {
    %c0_i32 = arith.constant 0 : i32
    %c0_i32_0 = arith.constant 0 : i32
    %c0_i32_1 = arith.constant 0 : i32
    return %c0_i32, %c0_i32_0 : i32, i32
  }
  func.func @transform_3(%arg0: i32) -> (i32, i32) {
    %c0_i32 = arith.constant 0 : i32
    %c0_i32_0 = arith.constant 0 : i32
    %c0_i32_1 = arith.constant 0 : i32
    return %c0_i32, %c0_i32_0 : i32, i32
  }
  func.func @transform_4(%arg0: i32) -> (i32, i32) {
    %c0_i32 = arith.constant 0 : i32
    %c0_i32_0 = arith.constant 0 : i32
    %c0_i32_1 = arith.constant 0 : i32
    return %c0_i32, %c0_i32_0 : i32, i32
  }
  func.func @transform_5(%arg0: i32) -> (i32, i32) {
    %c0_i32 = arith.constant 0 : i32
    %c0_i32_0 = arith.constant 0 : i32
    %c0_i32_1 = arith.constant 0 : i32
    return %c0_i32, %c0_i32_0 : i32, i32
  }
  func.func @transform_6(%arg0: i32) -> (i32, i32) {
    %c0_i32 = arith.constant 0 : i32
    %c0_i32_0 = arith.constant 0 : i32
    %c0_i32_1 = arith.constant 0 : i32
    return %c0_i32, %c0_i32_0 : i32, i32
  }
  func.func @transform_7(%arg0: i32) -> (i32, i32) {
    %c0_i32 = arith.constant 0 : i32
    %c0_i32_0 = arith.constant 0 : i32
    return %arg0, %c0_i32 : i32, i32
  }
}

</mosaic_0001>

<bundles_post_ra>
// kernel: tpu_custom_call.1
= control target key start
LH: loop header
LB: loop body
LE: loop exit
PB: predicated region body
PF: predicated region fallthrough
CT: control target
= control target key end

     0   :  { %s1211_s0 = inlined_call_operand.vmem [shape: f32[8,784], index: 0, kind: input, shape index: {}]   ;;  %s1212_s1 = inlined_call_operand.vmem [shape: bf16[784,64], index: 1, kind: input, shape index: {}]   ;;  %s1213_s2 = inlined_call_operand.vmem [shape: f32[1,64], index: 2, kind: input, shape index: {}]   ;;  %s1214_s3 = inlined_call_operand.vmem [shape: bf16[64,32], index: 3, kind: input, shape index: {}]   ;;  %s1215_s4 = inlined_call_operand.vmem [shape: f32[1,32], index: 4, kind: input, shape index: {}]   ;;  %s1216_s5 = inlined_call_operand.vmem [shape: bf16[32,10], index: 5, kind: input, shape index: {}]   ;;  %s1217_s6 = inlined_call_operand.vmem [shape: f32[1,10], index: 6, kind: input, shape index: {}]   ;;  %s1218_s7 = inlined_call_operand.hbm [shape: f32[8,10], index: 7, kind: output, shape index: {}]  }
   0x1   :  { %v887_v0 = vld [vmem:[%s1212_s1 + $0x38] sm:$0xff]  ;;  %v886_v3 = vld [vmem:[%s1212_s1 + $0x30] sm:$0xff]  ;;  %v885_v8 = vld [vmem:[%s1212_s1 + $0x28] sm:$0xff] }
   0x2   :  { %v895_v1 = vld [vmem:[%s1212_s1 + $0x78] sm:$0xff]  ;;  %442 = vmatpush.bf16.msra.mxu0 %v887_v0  ;;  %v894_v4 = vld [vmem:[%s1212_s1 + $0x70] sm:$0xff]  ;;  %v893_v9 = vld [vmem:[%s1212_s1 + $0x68] sm:$0xff] }
   0x3   :  { %v903_v2 = vld [vmem:[%s1212_s1 + $0xb8] sm:$0xff]  ;;  %455 = vmatpush.bf16.msra.mxu1 %v895_v1  ;;  %v902_v5 = vld [vmem:[%s1212_s1 + $0xb0] sm:$0xff]  ;;  %v901_v10 = vld [vmem:[%s1212_s1 + $0xa8] sm:$0xff] }
   0x4   :  { %468 = vmatpush.bf16.msra.mxu2 %v903_v2  ;;  %v911_v6 = vld [vmem:[%s1212_s1 + $0xf8] sm:$0xff]  ;;  %v910_v7 = vld [vmem:[%s1212_s1 + $0xf0] sm:$0xff]  ;;  %v909_v11 = vld [vmem:[%s1212_s1 + $0xe8] sm:$0xff] }
   0x5   :  { %481 = vmatpush.bf16.msra.mxu3 %v911_v6  ;;  %v884_v12 = vld [vmem:[%s1212_s1 + $0x20] sm:$0xff]  ;;  %v883_v16 = vld [vmem:[%s1212_s1 + $0x18] sm:$0xff] }
   0x6   :  { %443 = vmatpush.bf16.msra.mxu0 %v886_v3  ;;  %v892_v13 = vld [vmem:[%s1212_s1 + $0x60] sm:$0xff]  ;;  %v891_v17 = vld [vmem:[%s1212_s1 + $0x58] sm:$0xff] }
   0x7   :  { %456 = vmatpush.bf16.msra.mxu1 %v894_v4  ;;  %v900_v14 = vld [vmem:[%s1212_s1 + $0xa0] sm:$0xff]  ;;  %v899_v18 = vld [vmem:[%s1212_s1 + $0x98] sm:$0xff] }
   0x8   :  { %469 = vmatpush.bf16.msra.mxu2 %v902_v5  ;;  %v908_v15 = vld [vmem:[%s1212_s1 + $0xe0] sm:$0xff]  ;;  %v907_v19 = vld [vmem:[%s1212_s1 + $0xd8] sm:$0xff] }
   0x9   :  { %482 = vmatpush.bf16.msra.mxu3 %v910_v7 }
   0xa   :  { %444 = vmatpush.bf16.msra.mxu0 %v885_v8 }
   0xb   :  { %457 = vmatpush.bf16.msra.mxu1 %v893_v9 }
   0xc   :  { %470 = vmatpush.bf16.msra.mxu2 %v901_v10 }
   0xd   :  { %483 = vmatpush.bf16.msra.mxu3 %v909_v11 }
   0xe   :  { %445 = vmatpush.bf16.msra.mxu0 %v884_v12 }
   0xf   :  { %458 = vmatpush.bf16.msra.mxu1 %v892_v13 }
  0x10   :  { %471 = vmatpush.bf16.msra.mxu2 %v900_v14 }
  0x11   :  { %484 = vmatpush.bf16.msra.mxu3 %v908_v15 }
  0x12   :  { %12 = vsyncpa [#allocation3], 0  ;;  %446 = vmatpush.bf16.msra.mxu0 %v883_v16  ;;  %v882_v20 = vld [vmem:[%s1212_s1 + $0x10] sm:$0xff]  ;;  %v881_v24 = vld [vmem:[%s1212_s1 + $0x8] sm:$0xff]  ;;  %vm438_vm0 = vcmask 130048   ;;  %vm571_vm1 = vcmask 523264  }
  0x13   :  { %459 = vmatpush.bf16.msra.mxu1 %v891_v17  ;;  %v890_v21 = vld [vmem:[%s1212_s1 + $0x50] sm:$0xff]  ;;  %v889_v25 = vld [vmem:[%s1212_s1 + $0x48] sm:$0xff]  ;;  %v880_v27 = vld [vmem:[%s1212_s1] sm:$0xff]  ;;  %vm610_vm2 = vcmask 261120   ;;  %vm627_vm3 = vcmask 80896   ;;  %s648_s13 = sshll.u32 %s1218_s7, 4  ;;  %s649_s13 = int_to_ptr.hbm [resolvable:$true] %s648_s13 }
  0x14   :  { %472 = vmatpush.bf16.msra.mxu2 %v899_v18  ;;  %v898_v22 = vld [vmem:[%s1212_s1 + $0x90] sm:$0xff]  ;;  %v897_v26 = vld [vmem:[%s1212_s1 + $0x88] sm:$0xff]  ;;  %v888_v29 = vld [vmem:[%s1212_s1 + $0x40] sm:$0xff] }
  0x15   :  { %485 = vmatpush.bf16.msra.mxu3 %v907_v19  ;;  %v906_v23 = vld [vmem:[%s1212_s1 + $0xd0] sm:$0xff]  ;;  %v905_v28 = vld [vmem:[%s1212_s1 + $0xc8] sm:$0xff]  ;;  %v28_v30 = vld [vmem:[%s1211_s0] sm:$0xff] }
  0x16   :  { %447 = vmatpush.bf16.msra.mxu0 %v882_v20  ;;  %v29_v31 = vld [vmem:[%s1211_s0 + $0x8] sm:$0xff]  ;;  %v919_v32 = vld [vmem:[%s1212_s1 + $0x138] sm:$0xff]  ;;  %v896_v34 = vld [vmem:[%s1212_s1 + $0x80] sm:$0xff]  ;;  %v35_v36 = vpack.c.bf16 %v28_v30, %v28_v30 }
  0x17   :  { %460 = vmatpush.bf16.msra.mxu1 %v890_v21  ;;  %v927_v33 = vld [vmem:[%s1212_s1 + $0x178] sm:$0xff]  ;;  %v30_v35 = vld [vmem:[%s1211_s0 + $0x10] sm:$0xff]  ;;  %v36_v37 = vpack.c.bf16 %v29_v31, %v29_v31  ;;  %v904_v38 = vld [vmem:[%s1212_s1 + $0xc0] sm:$0xff] }
  0x18   :  { %473 = vmatpush.bf16.msra.mxu2 %v898_v22  ;;  %v928_v39 = vld [vmem:[%s1212_s1 + $0x180] sm:$0xff]  ;;  %v31_v40 = vld [vmem:[%s1211_s0 + $0x18] sm:$0xff]  ;;  %v918_v41 = vld [vmem:[%s1212_s1 + $0x130] sm:$0xff]  ;;  %v37_v43 = vpack.c.bf16 %v30_v35, %v30_v35 }
  0x19   :  { %486 = vmatpush.bf16.msra.mxu3 %v906_v23  ;;  %v926_v42 = vld [vmem:[%s1212_s1 + $0x170] sm:$0xff]  ;;  %v38_v44 = vpack.c.bf16 %v31_v40, %v31_v40  ;;  %v917_v45 = vld [vmem:[%s1212_s1 + $0x128] sm:$0xff]  ;;  %v916_v47 = vld [vmem:[%s1212_s1 + $0x120] sm:$0xff] }
  0x1a   :  { %448 = vmatpush.bf16.msra.mxu0 %v881_v24  ;;  %v925_v46 = vld [vmem:[%s1212_s1 + $0x168] sm:$0xff]  ;;  %v924_v48 = vld [vmem:[%s1212_s1 + $0x160] sm:$0xff]  ;;  %v915_v49 = vld [vmem:[%s1212_s1 + $0x118] sm:$0xff] }
  0x1b   :  { %461 = vmatpush.bf16.msra.mxu1 %v889_v25  ;;  %v923_v50 = vld [vmem:[%s1212_s1 + $0x158] sm:$0xff]  ;;  %v34_v51 = vld [vmem:[%s1211_s0 + $0x30] sm:$0xff]  ;;  %v913_v55 = vld [vmem:[%s1212_s1 + $0x108] sm:$0xff] }
  0x1c   :  { %474 = vmatpush.bf16.msra.mxu2 %v897_v26  ;;  %v914_v52 = vld [vmem:[%s1212_s1 + $0x110] sm:$0xff]  ;;  %v41_v54 = vpack.c.bf16 %v34_v51, %v34_v51  ;;  %v921_v56 = vld [vmem:[%s1212_s1 + $0x148] sm:$0xff]  ;;  %v912_v57 = vld [vmem:[%s1212_s1 + $0x100] sm:$0xff] }
  0x1d   :  { %487 = vmatpush.bf16.msra.mxu3 %v905_v28  ;;  %v922_v53 = vld [vmem:[%s1212_s1 + $0x150] sm:$0xff]  ;;  %v920_v58 = vld [vmem:[%s1212_s1 + $0x140] sm:$0xff]  ;;  %v33_v60 = vld [vmem:[%s1211_s0 + $0x28] sm:$0xff] }
  0x1e   :  { %449 = vmatpush.bf16.msra.mxu0 %v880_v27  ;;  %v32_v59 = vld [vmem:[%s1211_s0 + $0x20] sm:$0xff]  ;;  %v40_v62 = vpack.c.bf16 %v33_v60, %v33_v60  ;;  %v932_v63 = vld [vmem:[%s1214_s3 + $0x18] sm:$0xff]  ;;  %v931_v0 = vld [vmem:[%s1214_s3 + $0x10] sm:$0xff] }
  0x1f   :  { %462 = vmatpush.bf16.msra.mxu1 %v888_v29  ;;  %v39_v61 = vpack.c.bf16 %v32_v59, %v32_v59  ;;  %v930_v1 = vld [vmem:[%s1214_s3 + $0x8] sm:$0xff]  ;;  %v929_v4 = vld [vmem:[%s1214_s3] sm:$0xff] }
  0x20   :  { %475 = vmatpush.bf16.msra.mxu2 %v896_v34  ;;  %v934_v7 = vld [vmem:[%s1216_s5 + $0x8] sm:$0xff]  ;;  %v933_v10 = vld [vmem:[%s1216_s5] sm:$0xff] }
  0x21   :  { %450 = vmatmul.bf16.vlgmr.msra.gmra.mxu0 %v35_v36  ;;  %488 = vmatpush.bf16.msra.mxu3 %v904_v38  ;;  %v936_v11 = vld [vmem:[%s1213_s2] ss:$0 sm:$0xff] }
  0x22   :  { %494 = vmatpush.bf16.msrb.mxu0 %v919_v32  ;;  %463 = vmatmul.bf16.vlgmr.msra.gmra.mxu1 %v36_v37  ;;  %v937_v29 = vld [vmem:[%s1215_s4] ss:$0 sm:$0xff]  ;;  %s969_s4 = smov [#allocation2]  }
  0x23   :  { %507 = vmatpush.bf16.msrb.mxu1 %v927_v33  ;;  %476 = vmatmul.bf16.vlgmr.msra.gmra.mxu2 %v37_v43  ;;  %v938_v35 = vld [vmem:[%s1217_s6] ss:$0 sm:$0xff]  ;;  %s646_s6 = sshll.u32 %s969_s4, 4  ;;  %s647_s6 = int_to_ptr.vmem [resolvable:$true] %s646_s6 }
  0x24   :  { %527 = vmatpush.bf16.msrb.mxu2 %v928_v39  ;;  %489 = vmatmul.bf16.vlgmr.msra.gmra.mxu3 %v38_v44 }
  0x25   :  { %579 = vmatpush.bf16.msrb.mxu3 %v932_v63 }
  0x26   :  { %495 = vmatpush.bf16.msrb.mxu0 %v918_v41 }
  0x27   :  { %508 = vmatpush.bf16.msrb.mxu1 %v926_v42 }
  0x28   :  { %620 = vmatpush.bf16.msra.mxu2 %v934_v7 }
  0x29   :  { %580 = vmatpush.bf16.msrb.mxu3 %v931_v0 }
  0x2a   :  { %496 = vmatpush.bf16.msrb.mxu0 %v917_v45 }
  0x2b   :  { %509 = vmatpush.bf16.msrb.mxu1 %v925_v46 }
  0x2c   :  { %621 = vmatpush.bf16.msra.mxu2 %v933_v10 }
  0x2d   :  { %581 = vmatpush.bf16.msrb.mxu3 %v930_v1 }
  0x2e   :  { %497 = vmatpush.bf16.msrb.mxu0 %v916_v47 }
  0x2f   :  { %510 = vmatpush.bf16.msrb.mxu1 %v924_v48 }
  0x31   :  { %582 = vmatpush.bf16.msrb.mxu3 %v929_v4 }
  0x32   :  { %498 = vmatpush.bf16.msrb.mxu0 %v915_v49 }
  0x33   :  { %511 = vmatpush.bf16.msrb.mxu1 %v923_v50  ;;  %853 = vmatmul.msk.bf16.vlgmr.msrb.gmra.mxu2 %vm438_vm0, %v41_v54 }
  0x36   :  { %499 = vmatpush.bf16.msrb.mxu0 %v914_v52 }
  0x37   :  { %512 = vmatpush.bf16.msrb.mxu1 %v922_v53 }
  0x3a   :  { %500 = vmatpush.bf16.msrb.mxu0 %v913_v55 }
  0x3b   :  { %513 = vmatpush.bf16.msrb.mxu1 %v921_v56 }
  0x3e   :  { %501 = vmatpush.bf16.msrb.mxu0 %v912_v57 }
  0x3f   :  { %514 = vmatpush.bf16.msrb.mxu1 %v920_v58 }
  0x41   :  { %502 = vmatmul.bf16.vlgmr.msrb.gmra.mxu0 %v39_v61 }
  0x42   :  { %515 = vmatmul.bf16.vlgmr.msrb.gmra.mxu1 %v40_v62 }
  0x9e   :  { %v451_v2 = vpop.f32.mrf.mxu0 }
  0x9f   :  { %v464_v3 = vpop.f32.mrf.mxu1  ;;  %v452_v12 = vadd.f32 %v936_v11, %v451_v2 }
  0xa1   :  { %v465_v15 = vadd.f32 %v464_v3, %v452_v12 }
  0xa6   :  { %v453_v5 = vpop.f32.mrf.mxu0  ;;  %v477_v8 = vpop.f32.mrf.mxu2 }
  0xa7   :  { %v466_v6 = vpop.f32.mrf.mxu1  ;;  %v490_v9 = vpop.f32.mrf.mxu3  ;;  %v478_v16 = vadd.f32 %v477_v8, %v465_v15 }
  0xa9   :  { %v491_v18 = vadd.f32 %v490_v9, %v478_v16 }
  0xae   :  { %v479_v13 = vpop.f32.mrf.mxu2 }
  0xaf   :  { %v492_v14 = vpop.f32.mrf.mxu3 }
  0xb6   :  { %v529_v17 = vpop.f32.mrf.mxu2 }
  0xbe   :  { %v503_v19 = vpop.f32.mrf.mxu0  ;;  %v531_v23 = vpop.f32.mrf.mxu2 }
  0xbf   :  { %v516_v20 = vpop.f32.mrf.mxu1  ;;  %v504_v21 = vadd.f32 %v503_v19, %v491_v18 }
  0xc1   :  { %v517_v22 = vadd.f32 %v516_v20, %v504_v21 }
  0xc3   :  { %v530_v24 = vadd.f32 %v529_v17, %v517_v22 }
  0xc5   :  { %v533_v25 = vmax.f32 %v530_v24, 0.0 }
  0xc6   :  { %v505_v26 = vpop.f32.mrf.mxu0 }
  0xc7   :  { %v518_v27 = vpop.f32.mrf.mxu1  ;;  %v534_v28 = vpack.c.bf16 %v533_v25, %v533_v25 }
  0xc9   :  { %870 = vmatmul.msk.bf16.vlgmr.msrb.gmra.mxu3 %vm571_vm1, %v534_v28 }
 0x14c   :  { %v584_v30 = vpop.f32.mrf.mxu3 }
 0x14d   :  { %v585_v31 = vadd.f32 %v937_v29, %v584_v30 }
 0x14f   :  { %v588_v32 = vmax.f32 %v585_v31, 0.0 }
 0x151   :  { %v589_v33 = vpack.c.bf16 %v588_v32, %v588_v32 }
 0x153   :  { %879 = vmatmul.msk.bf16.vlgmr.msra.gmra.mxu2 %vm610_vm2, %v589_v33 }
 0x154   :  { %v586_v34 = vpop.f32.mrf.mxu3 }
 0x1d6   :  { %v623_v36 = vpop.f32.mrf.mxu2 }
 0x1d7   :  { %v624_v37 = vadd.f32 %v938_v35, %v623_v36 }
 0x1d9   :  { %v628_v38 = vsel %vm627_vm3, %v624_v37, -inf }
 0x1da   :  { %629 = vmax.xlane.f32.xlu0 %v628_v38 }
 0x1de   :  { %v625_v39 = vpop.f32.mrf.mxu2 }
 0x24d   :  { %v630_v40 = vpop.xlane.xlu0 %629 }
 0x24e   :  { %v631_v41 = vsub.f32 %v624_v37, %v630_v40 }
 0x250   :  { %v632_v42 = vmul.f32 1.442695, %v631_v41 }
 0x252   :  { %939 = vpow2.f32 %v632_v42 }
 0x258   :  { %v940_v43 = vpop.eup %939 }
 0x259   :  { %v634_v44 = vsel %vm627_vm3, %v940_v43, 0.0 }
 0x25a   :  { %635 = vadd.xlane.f32.xlu0 %v634_v44 }
 0x2cd   :  { %v636_v45 = vpop.xlane.xlu0 %635 }
 0x2ce   :  { %941 = vlog2.f32 %v636_v45 }
 0x2d4   :  { %v942_v46 = vpop.eup %941 }
 0x2d5   :  { %v638_v47 = vmul.f32 0.6931472, %v942_v46 }
 0x2d7   :  { %v639_v48 = vsub.f32 %v631_v41, %v638_v47 }
 0x2d9   :  { %640 = vst.msk [vmem:[#allocation2] sm:$0xff] %vm627_vm3, %v639_v48 }
 0x2da   :  { %651 = dma.vmem_to_hbm [thread:$0]  %s647_s6, 128, %s649_s13, [#allocation3]  }
 0x2db   :  { %967 = dma.done.wait [#allocation3], 128  }
 0x2dc   :  { %968 = vsyncadd [#allocation3], 4294967168 }
 0x2dd   :  { %656 = vsyncpa [#allocation3], 1 }

</bundles_post_ra>
